<compile_context>
chip_gen: v6e
topology: v6e:2x2x1
jax: 0.10.0
libtpu: 0.0.40
codegen_flags: <defaults>
</compile_context>

<pallas_src>
from functools import partial

import jax
import jax.numpy as jnp
from jax import lax
from jax.experimental import pallas as pl
from jax.experimental.pallas import tpu as pltpu

_OUT_LANES = 128        # one full vreg lane extent -> unmasked stores
_DEFAULT_TILE_B = 1024  # batch-tile rows (512-2048 sweet spot, ~1 MiB out tile)
_BN_EPS = 1e-5


def _round_up(n, m):
    return ((n + m - 1) // m) * m


def _policy_head_kernel(policy_batch_norm, num_actions,
                        x_ref, w_ref, b_ref, mean_ref, var_ref, out_ref):
    """One batch tile of the Policy head.

    x_ref    : (tile_b, E)   encoded state tile (cast to f32 in-kernel, so a
                             bf16 input halves the dominant HBM read)
    w_ref    : (E, 128)      fused head weight, lanes 0..A-1 = dist head,
                             lane A = critic, lanes A+1.. = 0 (BN affine folded)
    b_ref    : (1, 128)      fused bias, same lane layout
    mean_ref : (1, E)        BN batch mean  (precomputed over the FULL batch)
    var_ref  : (1, E)        BN batch var   (biased, precomputed)
    out_ref  : (tile_b, 128) lane 0 = value, 1 = action (f32), 2 = log-prob of
                             the argmax action, 3 = per-row entropy, 4.. = 0
    """
    x = x_ref[...].astype(jnp.float32)                           # (tb, E)

    if policy_batch_norm:
        # nn.BatchNorm1d training mode.  Stats arrive precomputed so the
        # kernel stays embarrassingly parallel over batch tiles; gamma/beta
        # affine is folded into w_ref/b_ref (see fuse_params).
        h = (x - mean_ref[...]) * lax.rsqrt(var_ref[...] + _BN_EPS)
    else:
        h = x

    # Single fused MXU pass over the 128-lane-padded weight: unmasked loads,
    # logits land lane-aligned at lane 0, critic value at lane A.
    y = jnp.dot(h, w_ref[...].astype(jnp.float32),
                preferred_element_type=jnp.float32) + b_ref[...]  # (tb, 128)

    tb = y.shape[0]
    lane = lax.broadcasted_iota(jnp.int32, (tb, _OUT_LANES), 1)
    is_logit = lane < num_actions

    value = y[:, num_actions:num_actions + 1]                     # (tb, 1)

    # Numerically stable softmax pieces over the masked 128-lane row (keeps
    # every intermediate full-vreg; padded lanes contribute exp(-big) = 0).
    z_full = jnp.where(is_logit, y, -1e30)
    m = jnp.max(z_full, axis=-1, keepdims=True)                   # (tb, 1)
    z = z_full - m
    ez = jnp.exp(z)
    se = jnp.sum(ez, axis=-1, keepdims=True)                      # (tb, 1)
    log_se = jnp.log(se)

    # deterministic action = argmax(logits) (first index on ties)
    action_f = jnp.min(jnp.where(z_full >= m, lane, _OUT_LANES),
                       axis=-1, keepdims=True).astype(jnp.float32)
    # TODO(synk): stochastic (multinomial) sampling for deterministic=False is
    # not implemented in-kernel; only the deterministic argmax path is provided.

    # log-prob of the argmax action: log_softmax at the row max == -log(se)
    alp = -log_se                                                 # (tb, 1)

    # per-row entropy:  H = log(se) - sum(ez * z) / se
    # (no (tb, A) divide / temporaries; batch mean is taken in the wrapper so
    #  batch tiling & megacore sharding stay exact)
    ent_row = log_se - jnp.sum(ez * z, axis=-1, keepdims=True) / se

    # Lane-dense output slab -> single unmasked full-vreg store per tile.
    slab = (jnp.where(lane == 0, value, 0.0)
            + jnp.where(lane == 1, action_f, 0.0)
            + jnp.where(lane == 2, alp, 0.0)
            + jnp.where(lane == 3, ent_row, 0.0))
    out_ref[...] = slab
    # TODO(synk): a transposed (8, tile_b) slab would cut writeback bytes ~16x
    # on the memory-bound stacked-batch path (matters most on v7x); kept the
    # (tile_b, 128) layout here for robust lowering.


def fuse_params(params, *, policy_batch_norm=True):
    """Fold critic_linear + Categorical head (+ BN affine) into one padded weight.

    Intended to be run ONCE per parameter update, not per forward call.
    Lane layout of the fused (E, 128) weight / (1, 128) bias:
      lanes 0..A-1 : action-distribution head (logits)
      lane  A      : critic value
      lanes A+1..  : zero padding (keeps loads unmasked / lane-dense)
    With BN:  y = (xn*gamma + beta) @ W + b = xn @ (gamma.T * W) + (beta @ W + b)
    """
    wa, wv = params["wa"], params["wv"]
    A = wa.shape[1]
    w = jnp.concatenate([wa, wv], axis=1)                        # (E, A+1)
    b = jnp.concatenate([params["ba"], params["bv"]], axis=1)    # (1, A+1)
    if policy_batch_norm:
        b = params["beta"] @ w + b        # uses the UNfolded weight
        w = params["gamma"].T * w         # scale each input row by gamma
    E = w.shape[0]
    w_pad = jnp.zeros((E, _OUT_LANES), jnp.float32).at[:, :A + 1].set(w)
    b_pad = jnp.zeros((1, _OUT_LANES), jnp.float32).at[:, :A + 1].set(b)
    return {"w": w_pad, "b": b_pad}


def policy_forward(encoded_state, fused_params, *, num_actions,
                   policy_batch_norm=True, tile_b=_DEFAULT_TILE_B):
    """Runs the Pallas kernel implementing the Policy head computation.

    Args:
      encoded_state: (B, E) float latent state produced by `encode` (abstract
        in the parent class, so treated as an input here).  Stack rollout
        timesteps into the batch axis ((T*B, E)) for throughput; the gridded
        kernel pipelines/tiles over that axis.
      fused_params: output of fuse_params (padded (E,128) weight, (1,128) bias).
    Returns:
      value (B,1) f32, action (B,1) i32, action_log_probs (B,1) f32,
      dist_entropy (1,1) f32.
    """
    B, E = encoded_state.shape
    x = encoded_state

    # BatchNorm1d training-mode statistics over the FULL (stacked) batch,
    # computed once up front so the batch-tiled kernel is exact per tile.
    if policy_batch_norm:
        xf = x.astype(jnp.float32)
        mean = jnp.mean(xf, axis=0, keepdims=True)                # (1, E)
        var = jnp.mean((xf - mean) ** 2, axis=0, keepdims=True)   # (1, E) biased
    else:
        mean = jnp.zeros((1, E), jnp.float32)
        var = jnp.ones((1, E), jnp.float32)

    # Batch tiling: rows padded up to a tile multiple; pads are sliced off.
    tile_b = max(8, min(_round_up(int(tile_b), 8), _round_up(B, 8)))
    n_tiles = pl.cdiv(B, tile_b)
    B_pad = n_tiles * tile_b
    if B_pad != B:
        x = jnp.pad(x, ((0, B_pad - B), (0, 0)))

    kernel = partial(_policy_head_kernel, policy_batch_norm, num_actions)
    const_map = lambda i: (0, 0)

    slab = pl.pallas_call(
        kernel,
        grid=(n_tiles,),
        in_specs=[
            pl.BlockSpec((tile_b, E), lambda i: (i, 0)),          # x: pipelined
            pl.BlockSpec((E, _OUT_LANES), const_map),             # w: resident
            pl.BlockSpec((1, _OUT_LANES), const_map),             # b: resident
            pl.BlockSpec((1, E), const_map),                      # mean: resident
            pl.BlockSpec((1, E), const_map),                      # var: resident
        ],
        out_specs=pl.BlockSpec((tile_b, _OUT_LANES), lambda i: (i, 0)),
        out_shape=jax.ShapeDtypeStruct((B_pad, _OUT_LANES), jnp.float32),
        compiler_params=pltpu.CompilerParams(
            dimension_semantics=("parallel",)),   # v7x megacore; no-op v5e/v6e
    )(x, fused_params["w"], fused_params["b"], mean, var)

    value = slab[:B, 0:1]
    action = slab[:B, 1:2].astype(jnp.int32)
    action_log_probs = slab[:B, 2:3]
    dist_entropy = jnp.mean(slab[:B, 3:4], axis=0, keepdims=True)
    return value, action, action_log_probs, dist_entropy


def init_params(key, encoding_dimension, num_actions):
    """Deterministic synthetic parameters matching Policy.__init__ shapes."""
    k1, k2, k3, k4 = jax.random.split(key, 4)
    E, A = encoding_dimension, num_actions
    return {
        # critic_linear: nn.Linear(E, 1) -> stored as (in, out)
        "wv": (jax.random.normal(k1, (E, 1), jnp.float32) / jnp.sqrt(E)).astype(jnp.float32),
        "bv": jnp.zeros((1, 1), jnp.float32),
        # Categorical dist head: nn.Linear(E, A) -> stored as (in, out)
        "wa": (0.05 * jax.random.normal(k2, (E, A), jnp.float32)).astype(jnp.float32),
        "ba": jnp.zeros((1, A), jnp.float32),
        # encoding_bn: nn.BatchNorm1d(E) affine params
        "gamma": (1.0 + 0.1 * jax.random.normal(k3, (1, E), jnp.float32)).astype(jnp.float32),
        "beta": (0.1 * jax.random.normal(k4, (1, E), jnp.float32)).astype(jnp.float32),
    }


def _reference(x, params):
    """Pure-JAX reference of the original, unfused Policy head math."""
    mean = jnp.mean(x, axis=0, keepdims=True)
    var = jnp.mean((x - mean) ** 2, axis=0, keepdims=True)
    h = (x - mean) / jnp.sqrt(var + _BN_EPS) * params["gamma"] + params["beta"]
    v_ref = h @ params["wv"] + params["bv"]
    logits_ref = h @ params["wa"] + params["ba"]
    lp_ref = jax.nn.log_softmax(logits_ref, axis=-1)
    a_ref = jnp.argmax(logits_ref, axis=-1, keepdims=True)
    alp_ref = jnp.take_along_axis(lp_ref, a_ref, axis=-1)
    ent_ref = jnp.mean(-jnp.sum(jnp.exp(lp_ref) * lp_ref, axis=-1))
    return v_ref, a_ref, alp_ref, ent_ref


if __name__ == "__main__":
    # TODO(synk): `encode` / `new_latent_state` are abstract in the parent
    # Policy class (provided by RNNPolicy/DVRLPolicy); the encoded latent state
    # is therefore a direct input here.  For throughput, stack T rollout
    # timesteps into the batch axis ((T*B, E)) — the gridded kernel tiles it.
    B = 8                      # number of parallel environments
    E = 32                     # encoding_dimension
    A = 4                      # action_space.n (Discrete)

    key = jax.random.PRNGKey(0)
    k_x, k_p, k_x2 = jax.random.split(key, 3)
    encoded_state = jax.random.normal(k_x, (B, E), jnp.float32)
    params = init_params(k_p, E, A)
    fused = fuse_params(params, policy_batch_norm=True)   # once per param update

    value, action, action_log_probs, dist_entropy = policy_forward(
        encoded_state, fused, num_actions=A, policy_batch_norm=True
    )
    jax.block_until_ready((value, action, action_log_probs, dist_entropy))

    # sanity check 1: single-tile path vs pure-JAX reference
    v_ref, a_ref, alp_ref, ent_ref = _reference(encoded_state, params)
    assert jnp.allclose(value, v_ref, atol=1e-4), "value mismatch"
    assert jnp.all(action[:, 0] == a_ref[:, 0]), "action mismatch"
    assert jnp.allclose(action_log_probs, alp_ref, atol=1e-4), "logprob mismatch"
    assert jnp.allclose(dist_entropy[0, 0], ent_ref, atol=1e-4), "entropy mismatch"

    # sanity check 2: multi-tile grid path (3 tiles of 8 rows + row padding)
    B2 = 20
    encoded_state2 = jax.random.normal(k_x2, (B2, E), jnp.float32)
    v2, a2, alp2, ent2 = policy_forward(
        encoded_state2, fused, num_actions=A, policy_batch_norm=True, tile_b=8
    )
    jax.block_until_ready((v2, a2, alp2, ent2))
    v2r, a2r, alp2r, ent2r = _reference(encoded_state2, params)
    assert jnp.allclose(v2, v2r, atol=1e-4), "value mismatch (multi-tile)"
    assert jnp.all(a2[:, 0] == a2r[:, 0]), "action mismatch (multi-tile)"
    assert jnp.allclose(alp2, alp2r, atol=1e-4), "logprob mismatch (multi-tile)"
    assert jnp.allclose(ent2[0, 0], ent2r, atol=1e-4), "entropy mismatch (multi-tile)"

    print("KERNEL_OK")
</pallas_src>

<mosaic_0001>
module attributes {stable_mosaic.version = 11 : i64} {
  func.func @_policy_head_kernel(%arg0: i32, %arg1: memref<8x32xf32, #tpu.memory_space<vmem>>, %arg2: memref<32x128xf32, #tpu.memory_space<vmem>>, %arg3: memref<1x128xf32, #tpu.memory_space<vmem>>, %arg4: memref<1x32xf32, #tpu.memory_space<vmem>>, %arg5: memref<1x32xf32, #tpu.memory_space<vmem>>, %arg6: memref<8x128xf32, #tpu.memory_space<vmem>>) attributes {dimension_semantics = [#tpu.dimension_semantics<parallel>], iteration_bounds = array<i64: 1>, scalar_prefetch = 0 : i64, scratch_operands = 0 : i64, tpu.core_type = #tpu.core_type<tc>, window_params = [{transform_indices = @transform_0, window_bounds = array<i64: 8, 32>}, {pipeline_mode = #tpu.pipeline_mode<synchronous>, transform_indices = @transform_1, window_bounds = array<i64: 32, 128>}, {pipeline_mode = #tpu.pipeline_mode<synchronous>, transform_indices = @transform_2, window_bounds = array<i64: 1, 128>}, {pipeline_mode = #tpu.pipeline_mode<synchronous>, transform_indices = @transform_3, window_bounds = array<i64: 1, 32>}, {pipeline_mode = #tpu.pipeline_mode<synchronous>, transform_indices = @transform_4, window_bounds = array<i64: 1, 32>}, {transform_indices = @transform_5, window_bounds = array<i64: 8, 128>}]} {
    %c0 = arith.constant 0 : index
    %c0_0 = arith.constant 0 : index
    %0 = vector.load %arg1[%c0, %c0_0] : memref<8x32xf32, #tpu.memory_space<vmem>>, vector<8x32xf32>
    %c0_1 = arith.constant 0 : index
    %c0_2 = arith.constant 0 : index
    %1 = vector.load %arg4[%c0_1, %c0_2] : memref<1x32xf32, #tpu.memory_space<vmem>>, vector<1x32xf32>
    %2 = vector.broadcast %1 : vector<1x32xf32> to vector<8x32xf32>
    %3 = arith.subf %0, %2 : vector<8x32xf32>
    %c0_3 = arith.constant 0 : index
    %c0_4 = arith.constant 0 : index
    %4 = vector.load %arg5[%c0_3, %c0_4] : memref<1x32xf32, #tpu.memory_space<vmem>>, vector<1x32xf32>
    %cst = arith.constant 9.99999974E-6 : f32
    %5 = vector.broadcast %cst : f32 to vector<1x32xf32>
    %6 = arith.addf %4, %5 : vector<1x32xf32>
    %7 = math.rsqrt %6 : vector<1x32xf32>
    %8 = vector.broadcast %7 : vector<1x32xf32> to vector<8x32xf32>
    %9 = arith.mulf %3, %8 : vector<8x32xf32>
    %c0_5 = arith.constant 0 : index
    %c0_6 = arith.constant 0 : index
    %10 = vector.load %arg2[%c0_5, %c0_6] : memref<32x128xf32, #tpu.memory_space<vmem>>, vector<32x128xf32>
    %cst_7 = arith.constant dense<0.000000e+00> : vector<8x128xf32>
    %11 = tpu.matmul %9, %10, %cst_7 {dimension_numbers = #tpu.dot_dimension_numbers<[1], [0], [0], [1], [0, 0, 1, 1], [], []>} : vector<8x32xf32>, vector<32x128xf32>, vector<8x128xf32> -> vector<8x128xf32>
    %c0_8 = arith.constant 0 : index
    %c0_9 = arith.constant 0 : index
    %12 = vector.load %arg3[%c0_8, %c0_9] : memref<1x128xf32, #tpu.memory_space<vmem>>, vector<1x128xf32>
    %13 = vector.broadcast %12 : vector<1x128xf32> to vector<8x128xf32>
    %14 = arith.addf %11, %13 : vector<8x128xf32>
    %15 = tpu.iota {dimensions = array<i32: 1>} : vector<8x128xi32>
    %c4_i32 = arith.constant 4 : i32
    %16 = vector.broadcast %c4_i32 : i32 to vector<8x128xi32>
    %17 = arith.cmpi slt, %15, %16 : vector<8x128xi32>
    %18 = vector.extract_strided_slice %14 {offsets = [0, 4], sizes = [8, 1], strides = [1, 1]} : vector<8x128xf32> to vector<8x1xf32>
    %cst_10 = arith.constant -1.000000e+30 : f32
    %19 = vector.broadcast %cst_10 : f32 to vector<8x128xf32>
    %20 = arith.select %17, %14, %19 : vector<8x128xi1>, vector<8x128xf32>
    %cst_11 = arith.constant dense<0xFF800000> : vector<8xf32>
    %21 = vector.multi_reduction <maximumf>, %20, %cst_11 [1] : vector<8x128xf32> to vector<8xf32>
    %22 = vector.shape_cast %21 : vector<8xf32> to vector<8x1xf32>
    %23 = vector.broadcast %22 : vector<8x1xf32> to vector<8x128xf32>
    %24 = arith.subf %20, %23 : vector<8x128xf32>
    %25 = math.exp %24 : vector<8x128xf32>
    %cst_12 = arith.constant dense<0.000000e+00> : vector<8xf32>
    %26 = vector.multi_reduction <add>, %25, %cst_12 [1] : vector<8x128xf32> to vector<8xf32>
    %27 = vector.shape_cast %26 : vector<8xf32> to vector<8x1xf32>
    %28 = math.log %27 : vector<8x1xf32>
    %29 = vector.broadcast %22 : vector<8x1xf32> to vector<8x128xf32>
    %30 = arith.cmpf oge, %20, %29 : vector<8x128xf32>
    %c128_i32 = arith.constant 128 : i32
    %31 = vector.broadcast %c128_i32 : i32 to vector<8x128xi32>
    %32 = arith.select %30, %15, %31 : vector<8x128xi1>, vector<8x128xi32>
    %cst_13 = arith.constant dense<2147483647> : vector<8xi32>
    %33 = vector.multi_reduction <minsi>, %32, %cst_13 [1] : vector<8x128xi32> to vector<8xi32>
    %34 = vector.shape_cast %33 : vector<8xi32> to vector<8x1xi32>
    %35 = arith.sitofp %34 : vector<8x1xi32> to vector<8x1xf32>
    %cst_14 = arith.constant 0.000000e+00 : f32
    %36 = vector.broadcast %cst_14 : f32 to vector<8x1xf32>
    %37 = arith.subf %36, %28 : vector<8x1xf32>
    %38 = arith.mulf %25, %24 : vector<8x128xf32>
    %cst_15 = arith.constant dense<0.000000e+00> : vector<8xf32>
    %39 = vector.multi_reduction <add>, %38, %cst_15 [1] : vector<8x128xf32> to vector<8xf32>
    %40 = vector.shape_cast %39 : vector<8xf32> to vector<8x1xf32>
    %41 = arith.divf %40, %27 : vector<8x1xf32>
    %42 = arith.subf %28, %41 : vector<8x1xf32>
    %c0_i32 = arith.constant 0 : i32
    %43 = vector.broadcast %c0_i32 : i32 to vector<8x128xi32>
    %44 = arith.cmpi eq, %15, %43 : vector<8x128xi32>
    %cst_16 = arith.constant 0.000000e+00 : f32
    %45 = vector.shape_cast %18 : vector<8x1xf32> to vector<8x1xf32>
    %46 = vector.broadcast %45 : vector<8x1xf32> to vector<8x128xf32>
    %47 = vector.broadcast %cst_16 : f32 to vector<8x128xf32>
    %48 = arith.select %44, %46, %47 : vector<8x128xi1>, vector<8x128xf32>
    %c1_i32 = arith.constant 1 : i32
    %49 = vector.broadcast %c1_i32 : i32 to vector<8x128xi32>
    %50 = arith.cmpi eq, %15, %49 : vector<8x128xi32>
    %cst_17 = arith.constant 0.000000e+00 : f32
    %51 = vector.shape_cast %35 : vector<8x1xf32> to vector<8x1xf32>
    %52 = vector.broadcast %51 : vector<8x1xf32> to vector<8x128xf32>
    %53 = vector.broadcast %cst_17 : f32 to vector<8x128xf32>
    %54 = arith.select %50, %52, %53 : vector<8x128xi1>, vector<8x128xf32>
    %55 = arith.addf %48, %54 : vector<8x128xf32>
    %c2_i32 = arith.constant 2 : i32
    %56 = vector.broadcast %c2_i32 : i32 to vector<8x128xi32>
    %57 = arith.cmpi eq, %15, %56 : vector<8x128xi32>
    %cst_18 = arith.constant 0.000000e+00 : f32
    %58 = vector.shape_cast %37 : vector<8x1xf32> to vector<8x1xf32>
    %59 = vector.broadcast %58 : vector<8x1xf32> to vector<8x128xf32>
    %60 = vector.broadcast %cst_18 : f32 to vector<8x128xf32>
    %61 = arith.select %57, %59, %60 : vector<8x128xi1>, vector<8x128xf32>
    %62 = arith.addf %55, %61 : vector<8x128xf32>
    %c3_i32 = arith.constant 3 : i32
    %63 = vector.broadcast %c3_i32 : i32 to vector<8x128xi32>
    %64 = arith.cmpi eq, %15, %63 : vector<8x128xi32>
    %cst_19 = arith.constant 0.000000e+00 : f32
    %65 = vector.shape_cast %42 : vector<8x1xf32> to vector<8x1xf32>
    %66 = vector.broadcast %65 : vector<8x1xf32> to vector<8x128xf32>
    %67 = vector.broadcast %cst_19 : f32 to vector<8x128xf32>
    %68 = arith.select %64, %66, %67 : vector<8x128xi1>, vector<8x128xf32>
    %69 = arith.addf %62, %68 : vector<8x128xf32>
    %c0_20 = arith.constant 0 : index
    %c0_21 = arith.constant 0 : index
    %70 = vector.load %arg6[%c0_20, %c0_21] : memref<8x128xf32, #tpu.memory_space<vmem>>, vector<8x128xf32>
    tpu.vector_store %arg6[%c0_20, %c0_21], %69 {strides = array<i32>} : memref<8x128xf32, #tpu.memory_space<vmem>>, vector<8x128xf32>,
    return
  }
  func.func @transform_0(%arg0: i32) -> (i32, i32) {
    %c0_i32 = arith.constant 0 : i32
    %c0_i32_0 = arith.constant 0 : i32
    return %arg0, %c0_i32 : i32, i32
  }
  func.func @transform_1(%arg0: i32) -> (i32, i32) {
    %c0_i32 = arith.constant 0 : i32
    %c0_i32_0 = arith.constant 0 : i32
    %c0_i32_1 = arith.constant 0 : i32
    return %c0_i32, %c0_i32_0 : i32, i32
  }
  func.func @transform_2(%arg0: i32) -> (i32, i32) {
    %c0_i32 = arith.constant 0 : i32
    %c0_i32_0 = arith.constant 0 : i32
    %c0_i32_1 = arith.constant 0 : i32
    return %c0_i32, %c0_i32_0 : i32, i32
  }
  func.func @transform_3(%arg0: i32) -> (i32, i32) {
    %c0_i32 = arith.constant 0 : i32
    %c0_i32_0 = arith.constant 0 : i32
    %c0_i32_1 = arith.constant 0 : i32
    return %c0_i32, %c0_i32_0 : i32, i32
  }
  func.func @transform_4(%arg0: i32) -> (i32, i32) {
    %c0_i32 = arith.constant 0 : i32
    %c0_i32_0 = arith.constant 0 : i32
    %c0_i32_1 = arith.constant 0 : i32
    return %c0_i32, %c0_i32_0 : i32, i32
  }
  func.func @transform_5(%arg0: i32) -> (i32, i32) {
    %c0_i32 = arith.constant 0 : i32
    %c0_i32_0 = arith.constant 0 : i32
    return %arg0, %c0_i32 : i32, i32
  }
}

</mosaic_0001>

<bundles_post_ra>
// kernel: tpu_custom_call.1
= control target key start
LH: loop header
LB: loop body
LE: loop exit
PB: predicated region body
PF: predicated region fallthrough
CT: control target
= control target key end

     0   :  { %10 = vsyncpa [#allocation3], 0  ;;  %s380_s0 = inlined_call_operand.hbm [shape: f32[8,32], index: 0, kind: input, shape index: {}]   ;;  %s381_s1 = inlined_call_operand.hbm [shape: f32[32,128], index: 1, kind: input, shape index: {}]   ;;  %s382_s2 = inlined_call_operand.vmem [shape: f32[1,128], index: 2, kind: input, shape index: {}]   ;;  %s383_s3 = inlined_call_operand.vmem [shape: f32[1,32], index: 3, kind: input, shape index: {}]   ;;  %s384_s4 = inlined_call_operand.vmem [shape: f32[1,32], index: 4, kind: input, shape index: {}]   ;;  %s385_s5 = inlined_call_operand.hbm [shape: f32[8,128], index: 5, kind: output, shape index: {}]  }
   0x1   :  { %11 = vsyncpa [#allocation6], 0 }
   0x2   :  { %12 = vsyncpa [#allocation4], 0  ;;  %s324_s18 = smov [#allocation2]   ;;  %s325_s20 = smov [#allocation5]  }
   0x3   :  { %s19_s19 = sshll.u32 %s324_s18, 4  ;;  %s28_s21 = sshll.u32 %s325_s20, 4  ;;  %s20_s19 = int_to_ptr.vmem [resolvable:$true] %s19_s19  ;;  %s29_s21 = int_to_ptr.vmem [resolvable:$true] %s28_s21 }
   0x4   :  { %s266_s22 = scalar_lea.vmem %s20_s19, 128  ;;  %p271_p1 = scmp.lt.s32.totalorder %s20_s19, %s20_s19 }
   0x5   :  { %p267_p0 = scmp.ne.s32.totalorder %s20_s19, %s266_s22  ;;  %p272_p2 = scmp.lt.s32.totalorder %s266_s22, %s266_s22 }
   0x7   :  { %p273_p3 = por %p272_p2, %p271_p1 }
   0x9   :  { %p274_p4 = pnand %p273_p3, %p267_p0 }
   0xb   :  { %277 = shalt.err (!%p274_p4)
}
   0xc   :  { %22 = dma.hbm_to_vmem [thread:$0]  %s380_s0, 128, %s20_s19, [#allocation3]  }
   0xd   :  { %s286_s25 = scalar_lea.vmem %s29_s21, 512  ;;  %p291_p6 = scmp.lt.s32.totalorder %s29_s21, %s29_s21 }
   0xe   :  { %p287_p5 = scmp.ne.s32.totalorder %s29_s21, %s286_s25  ;;  %p292_p7 = scmp.lt.s32.totalorder %s286_s25, %s286_s25 }
  0x10   :  { %p293_p8 = por %p292_p7, %p291_p6 }
  0x12   :  { %p294_p9 = pnand %p293_p8, %p287_p5 }
  0x14   :  { %297 = shalt.err (!%p294_p9)
}
  0x15   :  { %s326_s26 = smov 128   ;;  %s327_s27 = smov 8  }
  0x16   :  { %34 = dma.hbm_to_vmem [thread:$0]  %s381_s1, 512, %s29_s21, [#allocation6], %s326_s26, %s326_s26, %s327_s27  }
  0x17   :  { %318 = dma.done.wait [#allocation3], 128  }
  0x18   :  { %319 = vsyncadd [#allocation3], 4294967168 }
  0x19   :  { %320 = dma.done.wait [#allocation6], 512  }
  0x1a   :  { %321 = vsyncadd [#allocation6], 4294966784  ;;  %v328_v0 = vmov 0.0   ;;  %vm329_vm0 = vmmov 0   ;;  %v69_v1 = vld [vmem:[#allocation5 + $0x18] sm:$0xff]  ;;  %v68_v2 = vld [vmem:[#allocation5 + $0x10] sm:$0xff]  ;;  %v60_v7 = vlaneseq }
  0x1b   :  { %229 = vmatprep.subr.mxu0 %v328_v0  ;;  %237 = vmatprep.mubr.msk.f32.mxu0 %vm329_vm0, %v328_v0  ;;  %v67_v3 = vld [vmem:[#allocation5 + $0x8] sm:$0xff]  ;;  %v56_v4 = vld [vmem:[%s384_s4] sm:$0x1]  ;;  %v66_v6 = vld [vmem:[#allocation5] sm:$0xff]  ;;  %vm77_vm1 = vcmask 261120   ;;  %v330_v30 = vmov 4  }
  0x1c   :  { %230 = vmatpush3.msra.mxu0 %v69_v1  ;;  %v57_v5 = vadd.f32 1e-05, %v56_v4  ;;  %v61_v8 = vshrl.u32 %v60_v7, 7  ;;  %v47_v9 = vld [vmem:[#allocation2] sm:$0xff]  ;;  %v152_v16 = vand.u32 127, %v60_v7  ;;  %248 = vset.pattern.permute.xlu1 %v330_v30 }
  0x1d   :  { %231 = vmatprep.subr.mxu0 %v328_v0  ;;  %v221_v10 = vld [vmem:[%s383_s3] ss:$0 sm:$0xff]  ;;  %249 = vset.pattern.permute.xlu0 %v330_v30 }
  0x1e   :  { %232 = vmatpush3.msra.mxu0 %v68_v2  ;;  %250 = vrsqrt.f32 %v57_v5  ;;  %v62_v11 = vsub.s32 0, %v61_v8  ;;  %v55_v12 = vsub.f32 %v47_v9, %v221_v10  ;;  %v222_v17 = vld [vmem:[%s382_s2] ss:$0 sm:$0xff]  ;;  %vm153_vm2 = vcmp.lt.s32.totalorder %v152_v16, 4  ;;  %s331_s2 = smov [#allocation7]  }
  0x1f   :  { %233 = vmatprep.subr.mxu0 %v328_v0  ;;  %vm188_vm5 = vcmp.eq.s32.totalorder %v152_v16, 0  ;;  %vm195_vm6 = vcmp.eq.s32.totalorder %v152_v16, 1  ;;  %vm198_vm7 = vcmp.eq.s32.totalorder %v152_v16, 2  ;;  %vm201_vm8 = vcmp.eq.s32.totalorder %v152_v16, 3  ;;  %s211_s3 = sshll.u32 %s331_s2, 4  ;;  %s212_s3 = int_to_ptr.vmem [resolvable:$true] %s211_s3 }
  0x20   :  { %234 = vmatpush3.msra.mxu0 %v67_v3  ;;  %s298_s8 = scalar_lea.vmem %s212_s3, 128  ;;  %p303_p11 = scmp.lt.s32.totalorder %s212_s3, %s212_s3 }
  0x21   :  { %235 = vmatprep.subr.mxu0 %v328_v0  ;;  %p299_p10 = scmp.ne.s32.totalorder %s212_s3, %s298_s8  ;;  %p304_p12 = scmp.lt.s32.totalorder %s298_s8, %s298_s8 }
  0x22   :  { %236 = vmatpush3.msra.mxu0 %v66_v6 }
  0x23   :  { %p305_p13 = por %p304_p12, %p303_p11 }
  0x25   :  { %p306_p0 = pnand %p305_p13, %p299_p10 }
  0x2b   :  { %v251_v13 = vpop.eup %250 }
  0x2c   :  { %v63_v14 = vrot.slane %v251_v13, %v62_v11 }
  0x2e   :  { %v65_v15 = vmul.f32 %v63_v14, %v55_v12 }
  0x30   :  { %238 = vmatmul.mubr.msk.f32.vlgmr.msra.gmra.mxu0 %vm77_vm1, %v65_v15 }
  0xf0   :  { %v147_v18 = vpop.f32.mrf.mxu0 }
  0xf1   :  { %v148_v19 = vadd.f32 %v222_v17, %v147_v18 }
  0xf2   :  { %v239_v20 = vpop.f32.mrf.mxu0 }
  0xf3   :  { %v154_v21 = vsel %vm153_vm2, %v148_v19, -1e+30 }
  0xf4   :  { %155 = vmax.xlane.f32.xlu0 %v154_v21 }
 0x17d   :  { %v156_v22 = vpop.xlane.xlu0 %155 }
 0x17e   :  { %v157_v23 = vsub.f32 %v154_v21, %v156_v22  ;;  %vm164_vm3 = vcmp.ge.f32.partialorder %v154_v21, %v156_v22 }
 0x17f   :  { %v165_v24 = vsel %vm164_vm3, %v152_v16, 128 }
 0x180   :  { %v158_v25 = vmul.f32 1.442695, %v157_v23  ;;  %v167_v26 = vshra.s32 %v165_v24, 16  ;;  %v166_v31 = vand.u32 65535, %v165_v24 }
 0x182   :  { %252 = vpow2.f32 %v158_v25  ;;  %v169_v27 = vcvt.s32.f32 %v167_v26  ;;  %v168_v33 = vcvt.s32.f32 %v166_v31 }
 0x184   :  { %170 = vmin.xlane.f32.xlu0 %v169_v27 }
 0x18f   :  { %v253_v28 = vpop.eup %252 }
 0x190   :  { %160 = vadd.xlane.f32.xlu1 %v253_v28  ;;  %v182_v29 = vmul.f32 %v253_v28, %v157_v23 }
 0x192   :  { %183 = vadd.xlane.f32.xlu0 %v182_v29 }
 0x20d   :  { %v171_v32 = vpop.xlane.xlu0 %170 }
 0x20e   :  { %vm172_vm4 = vcmp.eq.f32.partialorder %v169_v27, %v171_v32  ;;  %v177_v36 = vcvt.f32.s32 %v171_v32 }
 0x20f   :  { %v173_v34 = vsel %vm172_vm4, %v168_v33, inf }
 0x210   :  { %174 = vmin.xlane.f32.xlu1 %v173_v34  ;;  %v178_v40 = vshll.u32 %v177_v36, 16 }
 0x219   :  { %v161_v35 = vpop.xlane.xlu1 %160 }
 0x21a   :  { %254 = vlog2.f32 %v161_v35 }
 0x21b   :  { %256 = vrcp.f32 %v161_v35  ;;  %v184_v43 = vpop.xlane.xlu0 %183 }
 0x221   :  { %191 = vperm.xlu1 %248, %v148_v19  }
 0x227   :  { %v255_v37 = vpop.eup %254 }
 0x228   :  { %v257_v38 = vpop.eup %256  ;;  %v163_v41 = vmul.f32 0.6931472, %v255_v37 }
 0x229   :  { %v186_v44 = vmul.f32 %v257_v38, %v184_v43 }
 0x22a   :  { %v181_v48 = vsub.f32 0.0, %v163_v41 }
 0x22b   :  { %v187_v49 = vsub.f32 %v163_v41, %v186_v44 }
 0x22c   :  { %v199_v53 = vsel %vm198_vm7, %v181_v48, 0.0 }
 0x22d   :  { %v202_v55 = vsel %vm201_vm8, %v187_v49, 0.0 }
 0x299   :  { %v175_v39 = vpop.xlane.xlu1 %174 }
 0x29a   :  { %v176_v42 = vcvt.f32.s32 %v175_v39 }
 0x29c   :  { %v179_v45 = vadd.s32 %v178_v40, %v176_v42 }
 0x29d   :  { %v192_v46 = vpop.permute.xlu1 %191 }
 0x29e   :  { %v180_v47 = vcvt.s32.f32 %v179_v45  ;;  %v194_v51 = vsel %vm188_vm5, %v192_v46, 0.0 }
 0x2a0   :  { %v196_v50 = vsel %vm195_vm6, %v180_v47, 0.0 }
 0x2a1   :  { %v197_v52 = vadd.f32 %v196_v50, %v194_v51 }
 0x2a3   :  { %v200_v54 = vadd.f32 %v199_v53, %v197_v52 }
 0x2a5   :  { %v203_v56 = vadd.f32 %v202_v55, %v200_v54 }
 0x2a7   :  { %204 = vst [vmem:[#allocation7] sm:$0xff] %v203_v56 }
 0x2a8   :  { %309 = shalt.err (!%p306_p0)
}
 0x2a9   :  { %214 = dma.vmem_to_hbm [thread:$0]  %s212_s3, 128, %s385_s5, [#allocation4]  }
 0x2aa   :  { %322 = dma.done.wait [#allocation4], 128  }
 0x2ab   :  { %323 = vsyncadd [#allocation4], 4294967168 }
 0x2ac   :  { %218 = vsyncpa [#allocation3], 1 }
 0x2ad   :  { %219 = vsyncpa [#allocation6], 1 }
 0x2ae   :  { %220 = vsyncpa [#allocation4], 1 }

</bundles_post_ra>
